<compile_context>
chip_gen: v7x
topology: tpu7x:2x2x1
jax: 0.10.0
libtpu: 0.0.40
codegen_flags: <defaults>
</compile_context>

<pallas_src>
import jax
import jax.numpy as jnp
from jax.experimental import pallas as pl
from jax.experimental.pallas import tpu as pltpu


LANE = 128      # lane width (last dim)
SUBLANE = 8     # sublane width (second-to-last dim)


def _round_up(x, m):
    return ((x + m - 1) // m) * m


def _hardswish(x):
    # PyTorch Hardswish: x * relu6(x + 3) / 6
    return x * jnp.clip(x + 3.0, 0.0, 6.0) * (1.0 / 6.0)


def actor_mlp_kernel(x_ref,
                     w1_ref, b1_ref,
                     w2_ref, b2_ref,
                     w3_ref, b3_ref,
                     w4_ref, b4_ref,
                     out_ref):
    # x is bf16; all dots take bf16 operands and accumulate in f32 on the MXU.
    x = x_ref[...]

    # Layer 1: Linear + ReLU (bias add / activation in f32)
    h = jnp.dot(x, w1_ref[...], preferred_element_type=jnp.float32) + b1_ref[...]
    h = jnp.maximum(h, 0.0)

    # Layer 2: Linear + ReLU
    h = jnp.dot(h.astype(jnp.bfloat16), w2_ref[...],
                preferred_element_type=jnp.float32) + b2_ref[...]
    h = jnp.maximum(h, 0.0)

    # Layer 3: Linear + Hardswish
    h = jnp.dot(h.astype(jnp.bfloat16), w3_ref[...],
                preferred_element_type=jnp.float32) + b3_ref[...]
    h = _hardswish(h)

    # Layer 4: Linear (logits / action_val)
    out = jnp.dot(h.astype(jnp.bfloat16), w4_ref[...],
                  preferred_element_type=jnp.float32) + b4_ref[...]
    out_ref[...] = out.astype(out_ref.dtype)


def actor_discrete_ppo_forward(state, params, *, batch_tile=512):
    """state: (B, state_dim) f32. params: dict of (in, out) weights + (1, out) biases."""
    B, S = state.shape
    mid_dim = params["w1"].shape[1]
    action_dim = params["w4"].shape[1]

    # Lane-dense padded widths; batch tile is a multiple of the sublane width.
    M = _round_up(mid_dim, LANE)
    A = _round_up(action_dim, LANE)
    TB = min(_round_up(batch_tile, SUBLANE), _round_up(B, SUBLANE))
    Bp = _round_up(B, TB)

    def pad2(a, rows, cols, dtype):
        out = jnp.zeros((rows, cols), dtype)
        return out.at[:a.shape[0], :a.shape[1]].set(a.astype(dtype))

    # bf16 activations/weights for the MXU; f32 biases.
    x = pad2(state, Bp, S, jnp.bfloat16)
    w1 = pad2(params["w1"], S, M, jnp.bfloat16)
    w2 = pad2(params["w2"], M, M, jnp.bfloat16)
    w3 = pad2(params["w3"], M, M, jnp.bfloat16)
    w4 = pad2(params["w4"], M, A, jnp.bfloat16)
    b1 = pad2(params["b1"], 1, M, jnp.float32)
    b2 = pad2(params["b2"], 1, M, jnp.float32)
    b3 = pad2(params["b3"], 1, M, jnp.float32)
    b4 = pad2(params["b4"], 1, A, jnp.float32)

    # Weights/biases: same block for every grid step -> stay VMEM-resident.
    resident = lambda a: pl.BlockSpec(a.shape, lambda i: (0, 0))

    grid = (Bp // TB,)

    # Advisory cost for XLA scheduling.
    flops = 2 * Bp * (S * M + 2 * M * M + M * A)
    bytes_accessed = (x.size * 2
                      + 2 * (w1.size + w2.size + w3.size + w4.size)
                      + 4 * (b1.size + b2.size + b3.size + b4.size)
                      + Bp * A * 4)

    # Explicit VMEM budget: resident weights + double-buffered tiles, with headroom.
    weight_bytes = (2 * (w1.size + w2.size + w3.size + w4.size)
                    + 4 * (b1.size + b2.size + b3.size + b4.size))
    act_bytes = 2 * TB * S + 4 * TB * M + 4 * TB * A
    vmem_limit = int(min(max(2 * (weight_bytes + 2 * act_bytes), 16 * 1024 * 1024),
                         48 * 1024 * 1024))

    out = pl.pallas_call(
        actor_mlp_kernel,
        out_shape=jax.ShapeDtypeStruct((Bp, A), jnp.float32),
        grid_spec=pltpu.PrefetchScalarGridSpec(
            num_scalar_prefetch=0,
            grid=grid,
            in_specs=[
                pl.BlockSpec((TB, S), lambda i: (i, 0)),
                resident(w1), resident(b1),
                resident(w2), resident(b2),
                resident(w3), resident(b3),
                resident(w4), resident(b4),
            ],
            out_specs=pl.BlockSpec((TB, A), lambda i: (i, 0)),
        ),
        compiler_params=pltpu.CompilerParams(
            dimension_semantics=("parallel",),
            vmem_limit_bytes=vmem_limit,
        ),
        cost_estimate=pl.CostEstimate(
            flops=int(flops), transcendentals=0,
            bytes_accessed=int(bytes_accessed)),
    )(x, w1, b1, w2, b2, w3, b3, w4, b4)

    # Slice logical (unpadded) result back out.
    return out[:B, :action_dim]


def init_params(key, state_dim, mid_dim, action_dim):
    """Deterministic init mimicking nn.Linear default (uniform +-1/sqrt(fan_in)).

    Weights stored pre-transposed: (in_features, out_features)."""
    dims = [(state_dim, mid_dim), (mid_dim, mid_dim),
            (mid_dim, mid_dim), (mid_dim, action_dim)]
    params = {}
    for i, (fin, fout) in enumerate(dims, start=1):
        key, kw, kb = jax.random.split(key, 3)
        bound = 1.0 / jnp.sqrt(fin)
        params[f"w{i}"] = jax.random.uniform(
            kw, (fin, fout), jnp.float32, -bound, bound)
        params[f"b{i}"] = jax.random.uniform(
            kb, (1, fout), jnp.float32, -bound, bound)
    return params


def reference_forward_f32(state, params):
    h = jnp.maximum(state @ params["w1"] + params["b1"], 0.0)
    h = jnp.maximum(h @ params["w2"] + params["b2"], 0.0)
    h = _hardswish(h @ params["w3"] + params["b3"])
    return h @ params["w4"] + params["b4"]


def reference_forward_bf16(state, params):
    # Matches the kernel's numerics: bf16 matmul operands, f32 accumulation,
    # bias add / activations in f32.
    dot = lambda a, w: jax.lax.dot(a.astype(jnp.bfloat16),
                                   w.astype(jnp.bfloat16),
                                   preferred_element_type=jnp.float32)
    h = jnp.maximum(dot(state, params["w1"]) + params["b1"], 0.0)
    h = jnp.maximum(dot(h, params["w2"]) + params["b2"], 0.0)
    h = _hardswish(dot(h, params["w3"]) + params["b3"])
    return dot(h, params["w4"]) + params["b4"]


if __name__ == "__main__":
    # Small shapes consistent with the module's Linear stack.
    batch, state_dim, mid_dim, action_dim = 2, 16, 32, 8

    key = jax.random.PRNGKey(0)
    key, k_state = jax.random.split(key)
    state = jax.random.normal(k_state, (batch, state_dim), jnp.float32)

    params = init_params(key, state_dim, mid_dim, action_dim)

    out = actor_discrete_ppo_forward(state, params)
    out = jax.block_until_ready(out)

    ref_bf16 = reference_forward_bf16(state, params)
    ref_f32 = reference_forward_f32(state, params)

    assert out.shape == (batch, action_dim)
    assert jnp.allclose(out, ref_bf16, atol=1e-3, rtol=1e-3), \
        "mismatch vs bf16-matmul reference"
    assert jnp.allclose(out, ref_f32, atol=5e-2, rtol=5e-2), \
        "mismatch vs f32 reference (beyond expected bf16 drift)"

    print("KERNEL_OK")
</pallas_src>

<mosaic_0001>
module attributes {stable_mosaic.version = 11 : i64} {
  func.func @actor_mlp_kernel(%arg0: i32, %arg1: memref<8x16xbf16, #tpu.memory_space<vmem>>, %arg2: memref<16x128xbf16, #tpu.memory_space<vmem>>, %arg3: memref<1x128xf32, #tpu.memory_space<vmem>>, %arg4: memref<128x128xbf16, #tpu.memory_space<vmem>>, %arg5: memref<1x128xf32, #tpu.memory_space<vmem>>, %arg6: memref<128x128xbf16, #tpu.memory_space<vmem>>, %arg7: memref<1x128xf32, #tpu.memory_space<vmem>>, %arg8: memref<128x128xbf16, #tpu.memory_space<vmem>>, %arg9: memref<1x128xf32, #tpu.memory_space<vmem>>, %arg10: memref<8x128xf32, #tpu.memory_space<vmem>>) attributes {dimension_semantics = [#tpu.dimension_semantics<parallel>], iteration_bounds = array<i64: 1>, scalar_prefetch = 0 : i64, scratch_operands = 0 : i64, tpu.core_type = #tpu.core_type<tc>, window_params = [{transform_indices = @transform_0, window_bounds = array<i64: 8, 16>}, {pipeline_mode = #tpu.pipeline_mode<synchronous>, transform_indices = @transform_1, window_bounds = array<i64: 16, 128>}, {pipeline_mode = #tpu.pipeline_mode<synchronous>, transform_indices = @transform_2, window_bounds = array<i64: 1, 128>}, {pipeline_mode = #tpu.pipeline_mode<synchronous>, transform_indices = @transform_3, window_bounds = array<i64: 128, 128>}, {pipeline_mode = #tpu.pipeline_mode<synchronous>, transform_indices = @transform_4, window_bounds = array<i64: 1, 128>}, {pipeline_mode = #tpu.pipeline_mode<synchronous>, transform_indices = @transform_5, window_bounds = array<i64: 128, 128>}, {pipeline_mode = #tpu.pipeline_mode<synchronous>, transform_indices = @transform_6, window_bounds = array<i64: 1, 128>}, {pipeline_mode = #tpu.pipeline_mode<synchronous>, transform_indices = @transform_7, window_bounds = array<i64: 128, 128>}, {pipeline_mode = #tpu.pipeline_mode<synchronous>, transform_indices = @transform_8, window_bounds = array<i64: 1, 128>}, {transform_indices = @transform_9, window_bounds = array<i64: 8, 128>}]} {
    %c0 = arith.constant 0 : index
    %c0_0 = arith.constant 0 : index
    %0 = vector.load %arg1[%c0, %c0_0] : memref<8x16xbf16, #tpu.memory_space<vmem>>, vector<8x16xbf16>
    %c0_1 = arith.constant 0 : index
    %c0_2 = arith.constant 0 : index
    %1 = vector.load %arg2[%c0_1, %c0_2] : memref<16x128xbf16, #tpu.memory_space<vmem>>, vector<16x128xbf16>
    %cst = arith.constant dense<0.000000e+00> : vector<8x128xf32>
    %2 = tpu.matmul %0, %1, %cst {dimension_numbers = #tpu.dot_dimension_numbers<[1], [0], [0], [1], [0, 0, 1, 1], [], []>} : vector<8x16xbf16>, vector<16x128xbf16>, vector<8x128xf32> -> vector<8x128xf32>
    %c0_3 = arith.constant 0 : index
    %c0_4 = arith.constant 0 : index
    %3 = vector.load %arg3[%c0_3, %c0_4] : memref<1x128xf32, #tpu.memory_space<vmem>>, vector<1x128xf32>
    %4 = vector.broadcast %3 : vector<1x128xf32> to vector<8x128xf32>
    %5 = arith.addf %2, %4 : vector<8x128xf32>
    %cst_5 = arith.constant 0.000000e+00 : f32
    %6 = vector.broadcast %cst_5 : f32 to vector<8x128xf32>
    %7 = arith.maximumf %5, %6 : vector<8x128xf32>
    %8 = arith.truncf %7 : vector<8x128xf32> to vector<8x128xbf16>
    %c0_6 = arith.constant 0 : index
    %c0_7 = arith.constant 0 : index
    %9 = vector.load %arg4[%c0_6, %c0_7] : memref<128x128xbf16, #tpu.memory_space<vmem>>, vector<128x128xbf16>
    %cst_8 = arith.constant dense<0.000000e+00> : vector<8x128xf32>
    %10 = tpu.matmul %8, %9, %cst_8 {dimension_numbers = #tpu.dot_dimension_numbers<[1], [0], [0], [1], [0, 0, 1, 1], [], []>} : vector<8x128xbf16>, vector<128x128xbf16>, vector<8x128xf32> -> vector<8x128xf32>
    %c0_9 = arith.constant 0 : index
    %c0_10 = arith.constant 0 : index
    %11 = vector.load %arg5[%c0_9, %c0_10] : memref<1x128xf32, #tpu.memory_space<vmem>>, vector<1x128xf32>
    %12 = vector.broadcast %11 : vector<1x128xf32> to vector<8x128xf32>
    %13 = arith.addf %10, %12 : vector<8x128xf32>
    %cst_11 = arith.constant 0.000000e+00 : f32
    %14 = vector.broadcast %cst_11 : f32 to vector<8x128xf32>
    %15 = arith.maximumf %13, %14 : vector<8x128xf32>
    %16 = arith.truncf %15 : vector<8x128xf32> to vector<8x128xbf16>
    %c0_12 = arith.constant 0 : index
    %c0_13 = arith.constant 0 : index
    %17 = vector.load %arg6[%c0_12, %c0_13] : memref<128x128xbf16, #tpu.memory_space<vmem>>, vector<128x128xbf16>
    %cst_14 = arith.constant dense<0.000000e+00> : vector<8x128xf32>
    %18 = tpu.matmul %16, %17, %cst_14 {dimension_numbers = #tpu.dot_dimension_numbers<[1], [0], [0], [1], [0, 0, 1, 1], [], []>} : vector<8x128xbf16>, vector<128x128xbf16>, vector<8x128xf32> -> vector<8x128xf32>
    %c0_15 = arith.constant 0 : index
    %c0_16 = arith.constant 0 : index
    %19 = vector.load %arg7[%c0_15, %c0_16] : memref<1x128xf32, #tpu.memory_space<vmem>>, vector<1x128xf32>
    %20 = vector.broadcast %19 : vector<1x128xf32> to vector<8x128xf32>
    %21 = arith.addf %18, %20 : vector<8x128xf32>
    %cst_17 = arith.constant 3.000000e+00 : f32
    %22 = vector.broadcast %cst_17 : f32 to vector<8x128xf32>
    %23 = arith.addf %21, %22 : vector<8x128xf32>
    %cst_18 = arith.constant 0.000000e+00 : f32
    %cst_19 = arith.constant 6.000000e+00 : f32
    %24 = vector.broadcast %cst_18 : f32 to vector<8x128xf32>
    %25 = arith.maximumf %24, %23 : vector<8x128xf32>
    %26 = vector.broadcast %cst_19 : f32 to vector<8x128xf32>
    %27 = arith.minimumf %26, %25 : vector<8x128xf32>
    %28 = arith.mulf %21, %27 : vector<8x128xf32>
    %cst_20 = arith.constant 0.166666672 : f32
    %29 = vector.broadcast %cst_20 : f32 to vector<8x128xf32>
    %30 = arith.mulf %28, %29 : vector<8x128xf32>
    %31 = arith.truncf %30 : vector<8x128xf32> to vector<8x128xbf16>
    %c0_21 = arith.constant 0 : index
    %c0_22 = arith.constant 0 : index
    %32 = vector.load %arg8[%c0_21, %c0_22] : memref<128x128xbf16, #tpu.memory_space<vmem>>, vector<128x128xbf16>
    %cst_23 = arith.constant dense<0.000000e+00> : vector<8x128xf32>
    %33 = tpu.matmul %31, %32, %cst_23 {dimension_numbers = #tpu.dot_dimension_numbers<[1], [0], [0], [1], [0, 0, 1, 1], [], []>} : vector<8x128xbf16>, vector<128x128xbf16>, vector<8x128xf32> -> vector<8x128xf32>
    %c0_24 = arith.constant 0 : index
    %c0_25 = arith.constant 0 : index
    %34 = vector.load %arg9[%c0_24, %c0_25] : memref<1x128xf32, #tpu.memory_space<vmem>>, vector<1x128xf32>
    %35 = vector.broadcast %34 : vector<1x128xf32> to vector<8x128xf32>
    %36 = arith.addf %33, %35 : vector<8x128xf32>
    %c0_26 = arith.constant 0 : index
    %c0_27 = arith.constant 0 : index
    %37 = vector.load %arg10[%c0_26, %c0_27] : memref<8x128xf32, #tpu.memory_space<vmem>>, vector<8x128xf32>
    tpu.vector_store %arg10[%c0_26, %c0_27], %36 {strides = array<i32>} : memref<8x128xf32, #tpu.memory_space<vmem>>, vector<8x128xf32>,
    return
  }
  func.func @transform_0(%arg0: i32) -> (i32, i32) {
    %c0_i32 = arith.constant 0 : i32
    %c0_i32_0 = arith.constant 0 : i32
    return %arg0, %c0_i32 : i32, i32
  }
  func.func @transform_1(%arg0: i32) -> (i32, i32) {
    %c0_i32 = arith.constant 0 : i32
    %c0_i32_0 = arith.constant 0 : i32
    %c0_i32_1 = arith.constant 0 : i32
    return %c0_i32, %c0_i32_0 : i32, i32
  }
  func.func @transform_2(%arg0: i32) -> (i32, i32) {
    %c0_i32 = arith.constant 0 : i32
    %c0_i32_0 = arith.constant 0 : i32
    %c0_i32_1 = arith.constant 0 : i32
    return %c0_i32, %c0_i32_0 : i32, i32
  }
  func.func @transform_3(%arg0: i32) -> (i32, i32) {
    %c0_i32 = arith.constant 0 : i32
    %c0_i32_0 = arith.constant 0 : i32
    %c0_i32_1 = arith.constant 0 : i32
    return %c0_i32, %c0_i32_0 : i32, i32
  }
  func.func @transform_4(%arg0: i32) -> (i32, i32) {
    %c0_i32 = arith.constant 0 : i32
    %c0_i32_0 = arith.constant 0 : i32
    %c0_i32_1 = arith.constant 0 : i32
    return %c0_i32, %c0_i32_0 : i32, i32
  }
  func.func @transform_5(%arg0: i32) -> (i32, i32) {
    %c0_i32 = arith.constant 0 : i32
    %c0_i32_0 = arith.constant 0 : i32
    %c0_i32_1 = arith.constant 0 : i32
    return %c0_i32, %c0_i32_0 : i32, i32
  }
  func.func @transform_6(%arg0: i32) -> (i32, i32) {
    %c0_i32 = arith.constant 0 : i32
    %c0_i32_0 = arith.constant 0 : i32
    %c0_i32_1 = arith.constant 0 : i32
    return %c0_i32, %c0_i32_0 : i32, i32
  }
  func.func @transform_7(%arg0: i32) -> (i32, i32) {
    %c0_i32 = arith.constant 0 : i32
    %c0_i32_0 = arith.constant 0 : i32
    %c0_i32_1 = arith.constant 0 : i32
    return %c0_i32, %c0_i32_0 : i32, i32
  }
  func.func @transform_8(%arg0: i32) -> (i32, i32) {
    %c0_i32 = arith.constant 0 : i32
    %c0_i32_0 = arith.constant 0 : i32
    %c0_i32_1 = arith.constant 0 : i32
    return %c0_i32, %c0_i32_0 : i32, i32
  }
  func.func @transform_9(%arg0: i32) -> (i32, i32) {
    %c0_i32 = arith.constant 0 : i32
    %c0_i32_0 = arith.constant 0 : i32
    return %arg0, %c0_i32 : i32, i32
  }
}

</mosaic_0001>

<bundles_post_ra>
// kernel: tpu_custom_call.1
= control target key start
LH: loop header
LB: loop body
LE: loop exit
PB: predicated region body
PF: predicated region fallthrough
CT: control target
= control target key end

     0   :  { %14 = vsyncpa [#allocation3], 0  ;;  %s1010_s0 = inlined_call_operand.hbm [shape: bf16[8,16], index: 0, kind: input, shape index: {}]   ;;  %s1011_s1 = inlined_call_operand.hbm [shape: bf16[16,128], index: 1, kind: input, shape index: {}]   ;;  %s1012_s2 = inlined_call_operand.vmem [shape: f32[1,128], index: 2, kind: input, shape index: {}]   ;;  %s1013_s3 = inlined_call_operand.hbm [shape: bf16[128,128], index: 3, kind: input, shape index: {}]   ;;  %s1014_s4 = inlined_call_operand.vmem [shape: f32[1,128], index: 4, kind: input, shape index: {}]   ;;  %s1015_s5 = inlined_call_operand.hbm [shape: bf16[128,128], index: 5, kind: input, shape index: {}]   ;;  %s1016_s6 = inlined_call_operand.vmem [shape: f32[1,128], index: 6, kind: input, shape index: {}]   ;;  %s1017_s7 = inlined_call_operand.hbm [shape: bf16[128,128], index: 7, kind: input, shape index: {}]   ;;  %s1018_s8 = inlined_call_operand.vmem [shape: f32[1,128], index: 8, kind: input, shape index: {}]   ;;  %s1019_s9 = inlined_call_operand.hbm [shape: f32[8,128], index: 9, kind: output, shape index: {}]  }
   0x1   :  { %15 = vsyncpa [#allocation6], 0 }
   0x2   :  { %16 = vsyncpa [#allocation9], 0 }
   0x3   :  { %17 = vsyncpa [#allocation4], 0  ;;  %s821_s30 = smov [#allocation5]   ;;  %s681_s13 = scalar_lea.hbm %s1011_s1, 128 }
   0x4   :  { %s33_s10 = sshll.u32 %s821_s30, 4  ;;  %p682_p0 = scmp.ne.s32.totalorder %s1011_s1, %s681_s13  ;;  %s34_s10 = int_to_ptr.vmem [resolvable:$true] %s33_s10 }
   0x5   :  { %p685_p1 = scmp.lt.u32.totalorder %s681_s13, %s1011_s1 }
   0x7   :  { %p687_p2 = pnand %p685_p1, %p682_p0 }
   0x9   :  { %690 = shalt.err (!%p687_p2)
}
   0xa   :  { %s691_s18 = scalar_lea.vmem %s34_s10, 128  ;;  %p696_p4 = scmp.lt.s32.totalorder %s34_s10, %s34_s10 }
   0xb   :  { %p692_p3 = scmp.ne.s32.totalorder %s34_s10, %s691_s18  ;;  %p697_p5 = scmp.lt.s32.totalorder %s691_s18, %s691_s18 }
   0xd   :  { %p698_p6 = por %p697_p5, %p696_p4 }
   0xf   :  { %p699_p7 = pnand %p698_p6, %p692_p3 }
  0x11   :  { %702 = shalt.err (!%p699_p7)
}
  0x12   :  { %s822_s19 = smov 64   ;;  %s823_s20 = smov 4  }
  0x13   :  { %39 = dma.hbm_to_vmem [thread:$0]  %s1011_s1, 128, %s34_s10, [#allocation6], %s822_s19, %s822_s19, %s823_s20  }
  0x14   :  { %s824_s23 = smov [#allocation8]   ;;  %s825_s25 = smov [#allocation2]  }
  0x15   :  { %s61_s24 = sshll.u32 %s824_s23, 4  ;;  %s24_s26 = sshll.u32 %s825_s25, 4  ;;  %s62_s24 = int_to_ptr.vmem [resolvable:$true] %s61_s24  ;;  %s25_s26 = int_to_ptr.vmem [resolvable:$true] %s24_s26 }
  0x16   :  { %s703_s29 = scalar_lea.hbm %s1015_s5, 1024 }
  0x17   :  { %p704_p8 = scmp.ne.s32.totalorder %s1015_s5, %s703_s29  ;;  %p707_p9 = scmp.lt.u32.totalorder %s703_s29, %s1015_s5 }
  0x19   :  { %p709_p10 = pnand %p707_p9, %p704_p8 }
  0x1b   :  { %712 = shalt.err (!%p709_p10)
}
  0x1c   :  { %s713_s1 = scalar_lea.vmem %s62_s24, 1024  ;;  %p718_p12 = scmp.lt.s32.totalorder %s62_s24, %s62_s24 }
  0x1d   :  { %p714_p11 = scmp.ne.s32.totalorder %s62_s24, %s713_s1  ;;  %p719_p13 = scmp.lt.s32.totalorder %s713_s1, %s713_s1 }
  0x1f   :  { %p720_p0 = por %p719_p13, %p718_p12 }
  0x21   :  { %p721_p1 = pnand %p720_p0, %p714_p11 }
  0x23   :  { %724 = shalt.err (!%p721_p1)
}
  0x24   :  { %67 = dma.hbm_to_vmem [thread:$0]  %s1015_s5, 1024, %s62_s24, [#allocation9], %s822_s19, %s822_s19, %s823_s20  }
  0x25   :  { %s725_s17 = scalar_lea.hbm %s1010_s0, 64 }
  0x26   :  { %p726_p2 = scmp.ne.s32.totalorder %s1010_s0, %s725_s17  ;;  %p729_p3 = scmp.lt.u32.totalorder %s725_s17, %s1010_s0 }
  0x28   :  { %p731_p4 = pnand %p729_p3, %p726_p2 }
  0x2a   :  { %734 = shalt.err (!%p731_p4)
}
  0x2b   :  { %s735_s25 = scalar_lea.vmem %s25_s26, 64  ;;  %p740_p6 = scmp.lt.s32.totalorder %s25_s26, %s25_s26 }
  0x2c   :  { %p736_p5 = scmp.ne.s32.totalorder %s25_s26, %s735_s25  ;;  %p741_p7 = scmp.lt.s32.totalorder %s735_s25, %s735_s25 }
  0x2e   :  { %p742_p8 = por %p741_p7, %p740_p6 }
  0x30   :  { %p743_p9 = pnand %p742_p8, %p736_p5 }
  0x32   :  { %746 = shalt.err (!%p743_p9)
}
  0x33   :  { %27 = dma.hbm_to_vmem [thread:$0]  %s1010_s0, 64, %s25_s26, [#allocation3]  }
  0x34   :  { %s826_s27 = smov [#allocation7]   ;;  %s827_s29 = smov [#allocation10]  }
  0x35   :  { %s47_s28 = sshll.u32 %s826_s27, 4  ;;  %s75_s30 = sshll.u32 %s827_s29, 4  ;;  %s48_s28 = int_to_ptr.vmem [resolvable:$true] %s47_s28  ;;  %s76_s30 = int_to_ptr.vmem [resolvable:$true] %s75_s30 }
  0x36   :  { %s747_s13 = scalar_lea.hbm %s1013_s3, 1024 }
  0x37   :  { %p748_p10 = scmp.ne.s32.totalorder %s1013_s3, %s747_s13  ;;  %p751_p11 = scmp.lt.u32.totalorder %s747_s13, %s1013_s3 }
  0x39   :  { %p753_p12 = pnand %p751_p11, %p748_p10 }
  0x3b   :  { %756 = shalt.err (!%p753_p12)
}
  0x3c   :  { %s757_s0 = scalar_lea.vmem %s48_s28, 1024  ;;  %p762_p0 = scmp.lt.s32.totalorder %s48_s28, %s48_s28 }
  0x3d   :  { %p758_p13 = scmp.ne.s32.totalorder %s48_s28, %s757_s0  ;;  %p763_p1 = scmp.lt.s32.totalorder %s757_s0, %s757_s0 }
  0x3f   :  { %p764_p2 = por %p763_p1, %p762_p0 }
  0x41   :  { %p765_p3 = pnand %p764_p2, %p758_p13 }
  0x43   :  { %768 = shalt.err (!%p765_p3)
}
  0x44   :  { %53 = dma.hbm_to_vmem [thread:$0]  %s1013_s3, 1024, %s48_s28, [#allocation6], %s822_s19, %s822_s19, %s823_s20  }
  0x45   :  { %s769_s21 = scalar_lea.hbm %s1017_s7, 1024 }
  0x46   :  { %p770_p4 = scmp.ne.s32.totalorder %s1017_s7, %s769_s21  ;;  %p773_p5 = scmp.lt.u32.totalorder %s769_s21, %s1017_s7 }
  0x48   :  { %p775_p6 = pnand %p773_p5, %p770_p4 }
  0x4a   :  { %778 = shalt.err (!%p775_p6)
}
  0x4b   :  { %s779_s24 = scalar_lea.vmem %s76_s30, 1024  ;;  %p784_p8 = scmp.lt.s32.totalorder %s76_s30, %s76_s30 }
  0x4c   :  { %p780_p7 = scmp.ne.s32.totalorder %s76_s30, %s779_s24  ;;  %p785_p9 = scmp.lt.s32.totalorder %s779_s24, %s779_s24 }
  0x4e   :  { %p786_p10 = por %p785_p9, %p784_p8 }
  0x50   :  { %p787_p11 = pnand %p786_p10, %p780_p7 }
  0x52   :  { %790 = shalt.err (!%p787_p11)
}
  0x53   :  { %81 = dma.hbm_to_vmem [thread:$0]  %s1017_s7, 1024, %s76_s30, [#allocation9], %s822_s19, %s822_s19, %s823_s20  }
  0x54   :  { %813 = dma.done.wait [#allocation3], 64  }
  0x55   :  { %814 = vsyncadd [#allocation3], 4294967232 }
  0x56   :  { %815 = dma.done.wait [#allocation6], 1152  }
  0x57   :  { %816 = vsyncadd [#allocation6], 4294966144 }
  0x58   :  { %817 = dma.done.wait [#allocation9], 2048  }
  0x59   :  { %818 = vsyncadd [#allocation9], 4294965248  ;;  %v828_v0 = vmov 0.0   ;;  %vm829_vm0 = vmmov 0   ;;  %v656_v1 = vld [vmem:[#allocation5] sm:$0xff]   ;;  %vm116_vm1 = vcmask 130048  }
  0x5a   :  { %580 = vmatprep.subr.bf16.mxu0 %v828_v0  ;;  %582 = vmatprep.mubr.msk.bf16.mxu0 %vm829_vm0, %v828_v0  ;;  %v100_v2 = vld [vmem:[#allocation2] sm:$0xf]  ;;  %v657_v3 = vld [vmem:[#allocation7] sm:$0xff]   ;;  %v658_v4 = vld [vmem:[#allocation7 + $0x8] sm:$0xff]   ;;  %s830_s11 = smov [#allocation11]  }
  0x5b   :  { %586 = vmatprep.subr.bf16.mxu1 %v828_v0  ;;  %602 = vmatprep.mubr.msk.bf16.mxu1 %vm829_vm0, %v828_v0  ;;  %v659_v5 = vld [vmem:[#allocation7 + $0x10] sm:$0xff]   ;;  %v660_v6 = vld [vmem:[#allocation7 + $0x18] sm:$0xff]   ;;  %v661_v7 = vld [vmem:[#allocation7 + $0x20] sm:$0xff]   ;;  %s510_s12 = sshll.u32 %s830_s11, 4  ;;  %s511_s12 = int_to_ptr.vmem [resolvable:$true] %s510_s12 }
  0x5c   :  { %581 = vmatpush3.bf16.msra.mxu0 %v656_v1  ;;  %587 = vmatpush3.bf16.msra.mxu1 %v657_v3  ;;  %v662_v8 = vld [vmem:[#allocation7 + $0x28] sm:$0xff]   ;;  %v663_v9 = vld [vmem:[#allocation7 + $0x30] sm:$0xff]   ;;  %v664_v10 = vld [vmem:[#allocation7 + $0x38] sm:$0xff]   ;;  %p796_p13 = scmp.lt.s32.totalorder %s511_s12, %s511_s12 }
  0x5d   :  { %606 = vmatprep.subr.bf16.mxu0 %v828_v0  ;;  %588 = vmatprep.subr.bf16.mxu1 %v828_v0  ;;  %v665_v11 = vld [vmem:[#allocation8] sm:$0xff]   ;;  %v666_v12 = vld [vmem:[#allocation8 + $0x8] sm:$0xff]   ;;  %v667_v13 = vld [vmem:[#allocation8 + $0x10] sm:$0xff]  }
  0x5e   :  { %v668_v14 = vld [vmem:[#allocation8 + $0x18] sm:$0xff]   ;;  %v669_v15 = vld [vmem:[#allocation8 + $0x20] sm:$0xff]   ;;  %v670_v16 = vld [vmem:[#allocation8 + $0x28] sm:$0xff]  }
  0x5f   :  { %583 = vmatmul.mubr.msk.bf16.vlgmr.msra.gmra.mrb[0].mxu0 %vm116_vm1, %v100_v2  ;;  %v521_v17 = vld [vmem:[%s1012_s2] ss:$0 sm:$0xff]  ;;  %v672_v26 = vld [vmem:[#allocation8 + $0x38] sm:$0xff]   ;;  %v673_v27 = vld [vmem:[#allocation10] sm:$0xff]  }
  0x60   :  { %622 = vmatprep.mubr.msk.bf16.mxu0 %vm829_vm0, %v828_v0  ;;  %589 = vmatpush3.bf16.msra.mxu1 %v658_v4  ;;  %v671_v25 = vld [vmem:[#allocation8 + $0x30] sm:$0xff]   ;;  %v674_v28 = vld [vmem:[#allocation10 + $0x8] sm:$0xff]   ;;  %v676_v30 = vld [vmem:[#allocation10 + $0x18] sm:$0xff]  }
  0x61   :  { %590 = vmatprep.subr.bf16.mxu1 %v828_v0  ;;  %607 = vmatpush3.bf16.msra.mxu0 %v665_v11  ;;  %v675_v29 = vld [vmem:[#allocation10 + $0x10] sm:$0xff]   ;;  %v677_v39 = vld [vmem:[#allocation10 + $0x20] sm:$0xff]   ;;  %v678_v40 = vld [vmem:[#allocation10 + $0x28] sm:$0xff]  }
  0x62   :  { %608 = vmatprep.subr.bf16.mxu0 %v828_v0  ;;  %v524_v31 = vld [vmem:[%s1014_s4] ss:$0 sm:$0xff]  ;;  %v680_v42 = vld [vmem:[#allocation10 + $0x38] sm:$0xff]  }
  0x63   :  { %v679_v41 = vld [vmem:[#allocation10 + $0x30] sm:$0xff]  }
  0x64   :  { %591 = vmatpush3.bf16.msra.mxu1 %v659_v5  ;;  %v533_v43 = vld [vmem:[%s1016_s6] ss:$0 sm:$0xff]  ;;  %s791_s6 = scalar_lea.vmem %s511_s12, 128 }
  0x65   :  { %592 = vmatprep.subr.bf16.mxu1 %v828_v0  ;;  %609 = vmatpush3.bf16.msra.mxu0 %v666_v12  ;;  %v542_v55 = vld [vmem:[%s1018_s8] ss:$0 sm:$0xff]  ;;  %p792_p12 = scmp.ne.s32.totalorder %s511_s12, %s791_s6  ;;  %p797_p0 = scmp.lt.s32.totalorder %s791_s6, %s791_s6 }
  0x66   :  { %610 = vmatprep.subr.bf16.mxu0 %v828_v0 }
  0x67   :  { %p798_p1 = por %p797_p0, %p796_p13 }
  0x68   :  { %593 = vmatpush3.bf16.msra.mxu1 %v660_v6 }
  0x69   :  { %594 = vmatprep.subr.bf16.mxu1 %v828_v0  ;;  %611 = vmatpush3.bf16.msra.mxu0 %v667_v13  ;;  %p799_p2 = pnand %p798_p1, %p792_p12 }
  0x6a   :  { %612 = vmatprep.subr.bf16.mxu0 %v828_v0 }
  0x6c   :  { %595 = vmatpush3.bf16.msra.mxu1 %v661_v7 }
  0x6d   :  { %596 = vmatprep.subr.bf16.mxu1 %v828_v0  ;;  %613 = vmatpush3.bf16.msra.mxu0 %v668_v14 }
  0x6e   :  { %614 = vmatprep.subr.bf16.mxu0 %v828_v0 }
  0x70   :  { %597 = vmatpush3.bf16.msra.mxu1 %v662_v8 }
  0x71   :  { %598 = vmatprep.subr.bf16.mxu1 %v828_v0  ;;  %615 = vmatpush3.bf16.msra.mxu0 %v669_v15 }
  0x72   :  { %616 = vmatprep.subr.bf16.mxu0 %v828_v0 }
  0x74   :  { %599 = vmatpush3.bf16.msra.mxu1 %v663_v9 }
  0x75   :  { %600 = vmatprep.subr.bf16.mxu1 %v828_v0  ;;  %617 = vmatpush3.bf16.msra.mxu0 %v670_v16 }
  0x76   :  { %618 = vmatprep.subr.bf16.mxu0 %v828_v0 }
  0x78   :  { %601 = vmatpush3.bf16.msra.mxu1 %v664_v10 }
  0x79   :  { %626 = vmatprep.subr.bf16.mxu1 %v828_v0  ;;  %619 = vmatpush3.bf16.msra.mxu0 %v671_v25 }
  0x7a   :  { %620 = vmatprep.subr.bf16.mxu0 %v828_v0 }
  0x7d   :  { %621 = vmatpush3.bf16.msra.mxu0 %v672_v26 }
 0x132   :  { %v154_v18 = vpop.f32.mrb[0].mxu0 }
 0x133   :  { %v155_v19 = vadd.f32 %v521_v17, %v154_v18  ;;  %v584_v20 = vpop.f32.mrb[1].mxu0 }
 0x134   :  { %v157_v21 = vpop.f32.mrb[2].mxu0 }
 0x135   :  { %v160_v22 = vmax.f32 %v155_v19, 0.0  ;;  %v585_v23 = vpop.f32.mrb[3].mxu0 }
 0x137   :  { %v161_v24 = vpack.c.bf16 %v160_v22, %v160_v22 }
 0x139   :  { %603 = vmatmul.mubr.bf16.vlgmr.msra.gmra.mrb[0].mxu1 %v161_v24 }
 0x13a   :  { %642 = vmatprep.mubr.msk.bf16.mxu1 %vm829_vm0, %v828_v0  ;;  %627 = vmatpush3.bf16.msra.mxu1 %v673_v27 }
 0x13b   :  { %628 = vmatprep.subr.bf16.mxu1 %v828_v0 }
 0x13e   :  { %629 = vmatpush3.bf16.msra.mxu1 %v674_v28 }
 0x13f   :  { %630 = vmatprep.subr.bf16.mxu1 %v828_v0 }
 0x142   :  { %631 = vmatpush3.bf16.msra.mxu1 %v675_v29 }
 0x143   :  { %632 = vmatprep.subr.bf16.mxu1 %v828_v0 }
 0x146   :  { %633 = vmatpush3.bf16.msra.mxu1 %v676_v30 }
 0x147   :  { %634 = vmatprep.subr.bf16.mxu1 %v828_v0 }
 0x14a   :  { %635 = vmatpush3.bf16.msra.mxu1 %v677_v39 }
 0x14b   :  { %636 = vmatprep.subr.bf16.mxu1 %v828_v0 }
 0x14e   :  { %637 = vmatpush3.bf16.msra.mxu1 %v678_v40 }
 0x14f   :  { %638 = vmatprep.subr.bf16.mxu1 %v828_v0 }
 0x152   :  { %639 = vmatpush3.bf16.msra.mxu1 %v679_v41 }
 0x153   :  { %640 = vmatprep.subr.bf16.mxu1 %v828_v0 }
 0x156   :  { %641 = vmatpush3.bf16.msra.mxu1 %v680_v42 }
 0x20c   :  { %v267_v32 = vpop.f32.mrb[0].mxu1 }
 0x20d   :  { %v268_v33 = vadd.f32 %v524_v31, %v267_v32  ;;  %v604_v34 = vpop.f32.mrb[1].mxu1 }
 0x20e   :  { %v270_v35 = vpop.f32.mrb[2].mxu1 }
 0x20f   :  { %v273_v36 = vmax.f32 %v268_v33, 0.0  ;;  %v605_v37 = vpop.f32.mrb[3].mxu1 }
 0x211   :  { %v274_v38 = vpack.c.bf16 %v273_v36, %v273_v36 }
 0x213   :  { %623 = vmatmul.mubr.bf16.vlgmr.msra.gmra.mrb[4].mxu0 %v274_v38 }
 0x2e6   :  { %v380_v44 = vpop.f32.mrb[4].mxu0 }
 0x2e7   :  { %v381_v45 = vadd.f32 %v533_v43, %v380_v44  ;;  %v624_v46 = vpop.f32.mrb[5].mxu0 }
 0x2e8   :  { %v383_v47 = vpop.f32.mrb[6].mxu0 }
 0x2e9   :  { %v386_v48 = vadd.f32 3.0, %v381_v45  ;;  %v625_v49 = vpop.f32.mrb[7].mxu0 }
 0x2eb   :  { %v387_v50 = vmax.f32 %v386_v48, 0.0 }
 0x2ed   :  { %v388_v51 = vmin.f32 %v387_v50, 6.0 }
 0x2ef   :  { %v389_v52 = vmul.f32 %v388_v51, %v381_v45 }
 0x2f1   :  { %v390_v53 = vmul.f32 0.16666667, %v389_v52 }
 0x2f3   :  { %v391_v54 = vpack.c.bf16 %v390_v53, %v390_v53 }
 0x2f5   :  { %643 = vmatmul.mubr.bf16.vlgmr.msra.gmra.mrb[4].mxu1 %v391_v54 }
 0x3c8   :  { %v497_v56 = vpop.f32.mrb[4].mxu1 }
 0x3c9   :  { %v498_v57 = vadd.f32 %v542_v55, %v497_v56  ;;  %v644_v58 = vpop.f32.mrb[5].mxu1 }
 0x3ca   :  { %v500_v59 = vpop.f32.mrb[6].mxu1 }
 0x3cb   :  { %503 = vst [vmem:[#allocation11] sm:$0xff] %v498_v57  ;;  %v645_v60 = vpop.f32.mrb[7].mxu1 }
 0x3cc   :  { %802 = shalt.err (!%p799_p2)
}
 0x3cd   :  { %s803_s8 = scalar_lea.hbm %s1019_s9, 128 }
 0x3ce   :  { %p804_p3 = scmp.ne.s32.totalorder %s1019_s9, %s803_s8  ;;  %p807_p4 = scmp.lt.u32.totalorder %s803_s8, %s1019_s9 }
 0x3d0   :  { %p809_p5 = pnand %p807_p4, %p804_p3 }
 0x3d2   :  { %812 = shalt.err (!%p809_p5)
}
 0x3d3   :  { %513 = dma.vmem_to_hbm [thread:$0]  %s511_s12, 128, %s1019_s9, [#allocation4]  }
 0x3d4   :  { %819 = dma.done.wait [#allocation4], 128  }
 0x3d5   :  { %820 = vsyncadd [#allocation4], 4294967168 }
 0x3d6   :  { %517 = vsyncpa [#allocation3], 1 }
 0x3d7   :  { %518 = vsyncpa [#allocation6], 1 }
 0x3d8   :  { %519 = vsyncpa [#allocation9], 1 }
 0x3d9   :  { %520 = vsyncpa [#allocation4], 1 }

</bundles_post_ra>
